<compile_context>
chip_gen: v6e
topology: v6e:2x2x1
jax: 0.10.0
libtpu: 0.0.40
codegen_flags: <defaults>
</compile_context>

<pallas_src>
import jax
import jax.numpy as jnp
from jax import lax
from jax.experimental import pallas as pl
from jax.experimental.pallas import tpu as pltpu

_LANE = 128
_SUBLANE = 8


def _round_up(v, m):
    return ((v + m - 1) // m) * m


def _make_combination_kernel(bb):
    def kernel(a2_ref, l0_ref, r0_ref, l1_ref, r1_ref, o_ref):
        """a2_ref : SMEM (2,) f32  — alpha_i^2 per sub-kernel
        l*_ref : VMEM (BB, d_i+2, TM)  augmented lhs tiles
        r*_ref : VMEM (BB, d_i+2, TN)  augmented rhs tiles
        o_ref  : VMEM (BB, TM, TN)
        With the wrapper-side augmentation
            lhs = [x/ell^2 ; -xx/(2 ell^2) ; 1],  rhs = [y ; 1 ; -yy/(2 ell^2)]
        the contraction lhs^T @ rhs equals -||x - y||^2 / (2 ell^2) exactly,
        so the per-element epilogue is clamp + exp + scale + add + one store.
        """
        a0 = a2_ref[0]
        a1 = a2_ref[1]
        # contract dim 0 of both operands (K = d+2 <= ~8, MXU is never the
        # binding unit; any lhs transpose Mosaic emits is a tiny (d+2, TM) op)
        dn = (((0,), (0,)), ((), ()))
        for b in range(bb):  # small static unroll over the batch block
            s0 = lax.dot_general(l0_ref[b], r0_ref[b], dn,
                                 preferred_element_type=jnp.float32)
            s1 = lax.dot_general(l1_ref[b], r1_ref[b], dn,
                                 preferred_element_type=jnp.float32)
            # min(s, 0) mirrors the reference's max(d2, 0) cancellation guard.
            tile = (a0 * jnp.exp(jnp.minimum(s0, 0.0))
                    + a1 * jnp.exp(jnp.minimum(s1, 0.0)))
            o_ref[b] = tile.astype(o_ref.dtype)   # single store, no RMW
    return kernel


def _augment(x, y, ell):
    """Wrapper-side (hoisted) augmentation for one sub-kernel."""
    inv_ell2 = 1.0 / (ell * ell)
    neg_half = -0.5 * inv_ell2
    xx = jnp.sum(x * x, axis=1, keepdims=True)          # (n, 1, mx)
    yy = jnp.sum(y * y, axis=1, keepdims=True)          # (n, 1, my)
    lhs = jnp.concatenate(
        [x * inv_ell2, neg_half * xx, jnp.ones_like(xx)], axis=1)
    rhs = jnp.concatenate(
        [y, jnp.ones_like(yy), neg_half * yy], axis=1)
    return lhs.astype(jnp.float32), rhs.astype(jnp.float32)


def _pad_last(a, new):
    pad = new - a.shape[-1]
    if pad == 0:
        return a
    return jnp.pad(a, ((0, 0), (0, 0), (0, pad)))


def _tile_and_pad(dim, cap, align):
    """Return (tile, padded_dim).  Single tile (padded to `align`) when it fits
    under `cap`; otherwise tile = cap (a multiple of 128) and the dim is padded
    to a multiple of the tile, so blocks are always lane/sublane legal."""
    padded_min = _round_up(dim, align)
    if padded_min <= cap:
        return padded_min, padded_min
    return cap, _round_up(dim, cap)


def _choose_batch_block(n, tm, tn, gm, gn, target_bytes=1 << 20, max_unroll=8):
    """Process several batch elements per grid step when tiles are tiny (to
    amortize ~0.35us/step), but keep at least 2 grid steps when possible so
    both TensorCores get work on megacore parts."""
    per_step = max(tm * tn * 4, 1)
    bb_cap = max(1, min(n, max_unroll, target_bytes // per_step))
    if gm == 1 and gn == 1 and n > 1:
        bb_cap = min(bb_cap, max(1, n // 2))
    bb = 1
    for b in range(1, bb_cap + 1):
        if n % b == 0:
            bb = b
    return bb


def _vmem_limit_bytes():
    """Per-generation scoped-VMEM limit (usage is only ~6 MiB double-buffered,
    but leave explicit headroom per the perf review)."""
    try:
        vmem = pltpu.get_tpu_info().vmem_capacity_bytes
    except Exception:
        return None
    if vmem >= 96 * 1024 * 1024:          # v5e / v6e (128 MiB physical)
        return 96 * 1024 * 1024
    return 48 * 1024 * 1024               # v7x (64 MiB physical)


def combination_forward(params, xs, ys, *, out_dtype=jnp.float32,
                        tm_cap=512, tn_cap=1024):
    """Fused Combination([QuadExp, QuadExp]) forward with Sum reduction.

    params : (2, 2) f32  [[alpha0, ell0], [alpha1, ell1]]
    xs, ys : lists of two arrays, x_i (n, d_i, mx), y_i (n, d_i, my)
    returns: (n, mx, my) in `out_dtype` (default f32; bf16 halves writeback
             bytes on v6e/v7x when the accuracy budget allows)
    """
    x0, x1 = xs
    y0, y1 = ys
    n, d0, mx = x0.shape
    _, _, my = y0.shape
    _, d1, _ = x1.shape
    assert x1.shape == (n, d1, mx) and y1.shape == (n, d1, my)

    params = jnp.asarray(params, jnp.float32)
    alpha2 = params[:, 0] * params[:, 0]                 # (2,) -> SMEM

    # Hoisted augmentation (xx/yy rows + 1/(2 ell^2) scaling baked into lhs).
    l0, r0 = _augment(x0.astype(jnp.float32), y0.astype(jnp.float32), params[0, 1])
    l1, r1 = _augment(x1.astype(jnp.float32), y1.astype(jnp.float32), params[1, 1])

    # Lane/sublane-legal tiles; pad instead of a full-extent VMEM fallback.
    tm, mx_pad = _tile_and_pad(mx, tm_cap, _SUBLANE)
    tn, my_pad = _tile_and_pad(my, tn_cap, _LANE)
    gm, gn = mx_pad // tm, my_pad // tn
    bb = _choose_batch_block(n, tm, tn, gm, gn)
    grid = (n // bb, gm, gn)

    l0 = _pad_last(l0, mx_pad)
    l1 = _pad_last(l1, mx_pad)
    r0 = _pad_last(r0, my_pad)
    r1 = _pad_last(r1, my_pad)

    out = pl.pallas_call(
        _make_combination_kernel(bb),
        out_shape=jax.ShapeDtypeStruct((n, mx_pad, my_pad), out_dtype),
        grid=grid,
        in_specs=[
            # alpha^2 scalars stay resident in SMEM (tiny; no data-dependent
            # index maps, so scalar prefetch is unnecessary).
            pl.BlockSpec(memory_space=pltpu.MemorySpace.SMEM),
            pl.BlockSpec((bb, d0 + 2, tm), lambda b, i, j: (b, 0, i)),   # lhs0
            pl.BlockSpec((bb, d0 + 2, tn), lambda b, i, j: (b, 0, j)),   # rhs0
            pl.BlockSpec((bb, d1 + 2, tm), lambda b, i, j: (b, 0, i)),   # lhs1
            pl.BlockSpec((bb, d1 + 2, tn), lambda b, i, j: (b, 0, j)),   # rhs1
        ],
        out_specs=pl.BlockSpec((bb, tm, tn), lambda b, i, j: (b, i, j)),
        compiler_params=pltpu.CompilerParams(
            dimension_semantics=("parallel", "parallel", "parallel"),
            vmem_limit_bytes=_vmem_limit_bytes()),
    )(alpha2, l0, r0, l1, r1)

    return out[:, :mx, :my]


def _reference(params, xs, ys):
    out = 0.0
    for i, (x, y) in enumerate(zip(xs, ys)):
        alpha, ell = params[i, 0], params[i, 1]
        d2 = (jnp.sum(x * x, axis=1)[:, :, None]
              + jnp.sum(y * y, axis=1)[:, None, :]
              - 2.0 * jnp.einsum("ndm,ndk->nmk", x, y))
        d2 = jnp.maximum(d2, 0.0)
        out = out + alpha ** 2 * jnp.exp(-d2 / (2.0 * ell ** 2))
    return out


if __name__ == "__main__":
    key = jax.random.PRNGKey(0)
    n, d, m = 2, 4, 16   # batch, input dim, number of points

    k0, k1, k2, k3 = jax.random.split(key, 4)
    # inputs for each of the two sub-kernels (lists, as in Combination.forward)
    xs = [jax.random.normal(k0, (n, d, m), jnp.float32),
          jax.random.normal(k1, (n, d, m), jnp.float32)]
    ys = [jax.random.normal(k2, (n, d, m), jnp.float32),
          jax.random.normal(k3, (n, d, m), jnp.float32)]

    # deterministic parameter init: [alpha, ell] per sub-kernel
    params = jnp.array([[1.0, 1.0],
                        [0.5, 2.0]], dtype=jnp.float32)

    out = jax.block_until_ready(combination_forward(params, xs, ys))
    ref = _reference(params, xs, ys)

    assert out.shape == (n, m, m)
    assert jnp.allclose(out, ref, atol=2e-5, rtol=1e-4), \
        float(jnp.max(jnp.abs(out - ref)))

    print("KERNEL_OK")
</pallas_src>

<mosaic_0001>
module attributes {stable_mosaic.version = 11 : i64} {
  func.func @kernel(%arg0: i32, %arg1: i32, %arg2: i32, %arg3: memref<2xf32, #tpu.memory_space<smem>>, %arg4: memref<1x6x16xf32, #tpu.memory_space<vmem>>, %arg5: memref<1x6x128xf32, #tpu.memory_space<vmem>>, %arg6: memref<1x6x16xf32, #tpu.memory_space<vmem>>, %arg7: memref<1x6x128xf32, #tpu.memory_space<vmem>>, %arg8: memref<1x16x128xf32, #tpu.memory_space<vmem>>) attributes {dimension_semantics = [#tpu.dimension_semantics<parallel>, #tpu.dimension_semantics<parallel>, #tpu.dimension_semantics<parallel>], iteration_bounds = array<i64: 2, 1, 1>, scalar_prefetch = 0 : i64, scratch_operands = 0 : i64, tpu.core_type = #tpu.core_type<tc>, window_params = [{transform_indices = @transform_0, window_bounds = array<i64: 2>}, {transform_indices = @transform_1, window_bounds = array<i64: 1, 6, 16>}, {transform_indices = @transform_2, window_bounds = array<i64: 1, 6, 128>}, {transform_indices = @transform_3, window_bounds = array<i64: 1, 6, 16>}, {transform_indices = @transform_4, window_bounds = array<i64: 1, 6, 128>}, {transform_indices = @transform_5, window_bounds = array<i64: 1, 16, 128>}]} {
    %c0 = arith.constant 0 : index
    %0 = memref.load %arg3[%c0] : memref<2xf32, #tpu.memory_space<smem>>
    %c1 = arith.constant 1 : index
    %1 = memref.load %arg3[%c1] : memref<2xf32, #tpu.memory_space<smem>>
    %c0_0 = arith.constant 0 : index
    %c0_1 = arith.constant 0 : index
    %c0_2 = arith.constant 0 : index
    %2 = vector.load %arg4[%c0_0, %c0_1, %c0_2] : memref<1x6x16xf32, #tpu.memory_space<vmem>>, vector<1x6x16xf32>
    %3 = vector.shape_cast %2 : vector<1x6x16xf32> to vector<6x16xf32>
    %c0_3 = arith.constant 0 : index
    %c0_4 = arith.constant 0 : index
    %c0_5 = arith.constant 0 : index
    %4 = vector.load %arg5[%c0_3, %c0_4, %c0_5] : memref<1x6x128xf32, #tpu.memory_space<vmem>>, vector<1x6x128xf32>
    %5 = vector.shape_cast %4 : vector<1x6x128xf32> to vector<6x128xf32>
    %cst = arith.constant dense<0.000000e+00> : vector<16x128xf32>
    %6 = tpu.matmul %3, %5, %cst {dimension_numbers = #tpu.dot_dimension_numbers<[0], [0], [1], [1], [0, 1, 1, 1], [], []>} : vector<6x16xf32>, vector<6x128xf32>, vector<16x128xf32> -> vector<16x128xf32>
    %c0_6 = arith.constant 0 : index
    %c0_7 = arith.constant 0 : index
    %c0_8 = arith.constant 0 : index
    %7 = vector.load %arg6[%c0_6, %c0_7, %c0_8] : memref<1x6x16xf32, #tpu.memory_space<vmem>>, vector<1x6x16xf32>
    %8 = vector.shape_cast %7 : vector<1x6x16xf32> to vector<6x16xf32>
    %c0_9 = arith.constant 0 : index
    %c0_10 = arith.constant 0 : index
    %c0_11 = arith.constant 0 : index
    %9 = vector.load %arg7[%c0_9, %c0_10, %c0_11] : memref<1x6x128xf32, #tpu.memory_space<vmem>>, vector<1x6x128xf32>
    %10 = vector.shape_cast %9 : vector<1x6x128xf32> to vector<6x128xf32>
    %cst_12 = arith.constant dense<0.000000e+00> : vector<16x128xf32>
    %11 = tpu.matmul %8, %10, %cst_12 {dimension_numbers = #tpu.dot_dimension_numbers<[0], [0], [1], [1], [0, 1, 1, 1], [], []>} : vector<6x16xf32>, vector<6x128xf32>, vector<16x128xf32> -> vector<16x128xf32>
    %cst_13 = arith.constant 0.000000e+00 : f32
    %12 = vector.broadcast %cst_13 : f32 to vector<16x128xf32>
    %13 = arith.minimumf %6, %12 : vector<16x128xf32>
    %14 = math.exp %13 : vector<16x128xf32>
    %15 = vector.broadcast %0 : f32 to vector<16x128xf32>
    %16 = arith.mulf %15, %14 : vector<16x128xf32>
    %cst_14 = arith.constant 0.000000e+00 : f32
    %17 = vector.broadcast %cst_14 : f32 to vector<16x128xf32>
    %18 = arith.minimumf %11, %17 : vector<16x128xf32>
    %19 = math.exp %18 : vector<16x128xf32>
    %20 = vector.broadcast %1 : f32 to vector<16x128xf32>
    %21 = arith.mulf %20, %19 : vector<16x128xf32>
    %22 = arith.addf %16, %21 : vector<16x128xf32>
    %c0_15 = arith.constant 0 : index
    %c0_16 = arith.constant 0 : index
    %c0_17 = arith.constant 0 : index
    %23 = vector.load %arg8[%c0_15, %c0_16, %c0_17] : memref<1x16x128xf32, #tpu.memory_space<vmem>>, vector<1x16x128xf32>
    %24 = vector.shape_cast %23 : vector<1x16x128xf32> to vector<16x128xf32>
    %25 = vector.shape_cast %22 : vector<16x128xf32> to vector<1x16x128xf32>
    tpu.vector_store %arg8[%c0_15, %c0_16, %c0_17], %25 {strides = array<i32>} : memref<1x16x128xf32, #tpu.memory_space<vmem>>, vector<1x16x128xf32>,
    return
  }
  func.func @transform_0(%arg0: i32, %arg1: i32, %arg2: i32) -> i32 {
    %c0_i32 = arith.constant 0 : i32
    %c0_i32_0 = arith.constant 0 : i32
    return %c0_i32 : i32
  }
  func.func @transform_1(%arg0: i32, %arg1: i32, %arg2: i32) -> (i32, i32, i32) {
    %c0_i32 = arith.constant 0 : i32
    %c0_i32_0 = arith.constant 0 : i32
    return %arg0, %c0_i32, %arg1 : i32, i32, i32
  }
  func.func @transform_2(%arg0: i32, %arg1: i32, %arg2: i32) -> (i32, i32, i32) {
    %c0_i32 = arith.constant 0 : i32
    %c0_i32_0 = arith.constant 0 : i32
    return %arg0, %c0_i32, %arg2 : i32, i32, i32
  }
  func.func @transform_3(%arg0: i32, %arg1: i32, %arg2: i32) -> (i32, i32, i32) {
    %c0_i32 = arith.constant 0 : i32
    %c0_i32_0 = arith.constant 0 : i32
    return %arg0, %c0_i32, %arg1 : i32, i32, i32
  }
  func.func @transform_4(%arg0: i32, %arg1: i32, %arg2: i32) -> (i32, i32, i32) {
    %c0_i32 = arith.constant 0 : i32
    %c0_i32_0 = arith.constant 0 : i32
    return %arg0, %c0_i32, %arg2 : i32, i32, i32
  }
  func.func @transform_5(%arg0: i32, %arg1: i32, %arg2: i32) -> (i32, i32, i32) {
    %c0_i32 = arith.constant 0 : i32
    return %arg0, %arg1, %arg2 : i32, i32, i32
  }
}

</mosaic_0001>

<bundles_post_ra>
// kernel: tpu_custom_call.1
= control target key start
LH: loop header
LB: loop body
LE: loop exit
PB: predicated region body
PF: predicated region fallthrough
CT: control target
= control target key end

     0   :  { %10 = vsyncpa [#allocation4], 0  ;;  %s1162_s0 = inlined_call_operand.vmem [shape: f32[2], index: 0, kind: input, shape index: {}]   ;;  %s1163_s1 = inlined_call_operand.vmem [shape: f32[2,6,16], index: 1, kind: input, shape index: {}]   ;;  %s1164_s2 = inlined_call_operand.vmem [shape: f32[2,6,128], index: 2, kind: input, shape index: {}]   ;;  %s1165_s3 = inlined_call_operand.vmem [shape: f32[2,6,16], index: 3, kind: input, shape index: {}]   ;;  %s1166_s4 = inlined_call_operand.vmem [shape: f32[2,6,128], index: 4, kind: input, shape index: {}]   ;;  %s1167_s5 = inlined_call_operand.hbm [shape: f32[2,16,128], index: 5, kind: output, shape index: {}]  }
   0x1   :  { %11 = vsyncpa [#allocation3], 0 }
   0x2   :  { %13 = vsyncpa [#allocation3 + $0x1], 0  ;;  %s1018_s18 = smov 0   ;;  %s1020_s19 = smov 0  }
   0x3   :  { %s1022_s20 = smov 0   ;;  %s1024_s21 = smov 0  }
   0x4   :  { %s1026_s22 = smov 0   ;;  %s1028_s23 = smov 0  }
   0x5 LB: > { %s769_s24 = sadd.s32 4294967295, %s982_s23   ;;  %s770_s25 = sadd.s32 4294967294, %s982_s23   ;;  %s982_s23 = sphi %s1028_s23, %s19_s23   ;;  %s978_s22 = sphi %s1026_s22, %s1176_s22   ;;  %s974_s21 = sphi %s1024_s21, %s1175_s21   ;;  %s970_s20 = sphi %s1022_s20, %s1174_s20   ;;  %s966_s19 = sphi %s1020_s19, %s1173_s19   ;;  %s962_s18 = sphi %s1018_s18, %s1172_s18  }
   0x6   : > { %s38_s26 = sadd.s32 1, %s978_s22  ;;  %s182_s27 = sadd.s32 1, %s970_s20 }
   0x7   : > { %p40_p0 = scmp.ge.s32.totalorder %s38_s26, 2  ;;  %p192_p1 = scmp.ne.s32.totalorder %s970_s20, %s966_s19 }
   0x8   : > { %p193_p2 = scmp.eq.s32.totalorder %s769_s24, 1  ;;  %p198_p3 = scmp.ne.s32.totalorder %s966_s19, %s962_s18 }
   0x9   : > { %s1178_s26 = smov (%p40_p0, %s38_s26), 0  ;;  %p199_p5 = scmp.eq.s32.totalorder %s770_s25, 1 }
   0xa   : > { %p1058_p4 = por %p193_p2, %p192_p1  ;;  %s175_s29 = ssub.s32 %s978_s22, %s1178_s26 }
   0xb   : > { %p771_p6 = scmp.ge.s32.totalorder %s982_s23, 1  ;;  %p180_p7 = scmp.eq.s32.totalorder %s175_s29, 0 }
   0xc   : > { %p1065_p8 = por %p199_p5, %p198_p3  ;;  %p206_p9 = scmp.lt.s32.totalorder %s982_s23, 3 }
   0xd   : > { %s1071_s6 = scalar_select %p180_p7, %s970_s20, %s182_s27  }
   0xe   : > { %p1073_p10 = pnand %p771_p6, %p206_p9  ;;  %p1077_p11 = scmp.eq.s32.totalorder %s769_s24, 0 }
   0xf   : > { %s219_s11 = sshll.u32 %s1162_s0, 4  ;;  %s220_s11 = int_to_ptr.vmem [resolvable:$true] %s219_s11 }
  0x10   : > { %p816_p12 = pneg %p1073_p10  ;;  %s887_s12 = scalar_lea.vmem %s220_s11, 16 }
  0x11   : > { %p888_p0 = scmp.ne.s32.totalorder %s220_s11, %s887_s12  ;;  %p895_p5 = scmp.lt.s32.totalorder %s220_s11, %s220_s11 }
  0x12   : > { %p817_p13 = pnand %p1077_p11, %p816_p12  ;;  %p896_p6 = scmp.lt.s32.totalorder %s887_s12, %s887_s12 }
  0x14   : > { %p889_p1 = pneg %p817_p13  ;;  %p897_p7 = por %p896_p6, %p895_p5 }
  0x16   : > { %p890_p2 = pnand %p889_p1, %p888_p0 }
  0x18   : > { %p891_p3 = pneg %p890_p2 }
  0x1a   : > { %p898_p9 = pnand %p897_p7, %p891_p3 }
  0x1c   : > { %901 = shalt.err (!%p898_p9)
}
  0x1d   : > { %s984_s13 = smov [#allocation2]   ;;  %272 = sbr.rel (%p1073_p10) target bundleno = 412 (0x19c), region = 40 }
  0x1e   : > { %819 = dma.vmem_to_smem (!%p817_p13), %s220_s11, 16, %s984_s13, [#allocation4]  }
  0x22   : > { %953 = dma.done.wait (%p1077_p11), [#allocation4], 16  }
  0x23   : > { %955 = vsyncadd (%p1077_p11), [#allocation4], 4294967280 }
  0x24   : > { %278 = sfence }
  0x25   : > { %p324_p12 = scmp.lt.s32.totalorder %s974_s21, 1  ;;  %vm396_vm0 = vcmask 1045504   ;;  %vm389_vm1 = vcmask 48128   ;;  %s353_s13 = sld [smem:[#allocation2]] }
  0x26   : > { %s793_s17 = sshll.u32 %s974_s21, 8 }
  0x27   : > { %s325_s14 = scalar_select %p324_p12, %s974_s21, 1 }
  0x28   : > { %s1113_s7 = scalar_lea.hbm %s1167_s5, %s793_s17 }
  0x29   : > { %s777_s15 = sshll.u32 %s325_s14, 3  ;;  %s781_s14 = sld [smem:[#allocation2 + $0x1]] }
  0x2a   : > { %s330_s24 = scalar_lea.vmem %s1163_s1, %s777_s15  ;;  %s344_s29 = scalar_lea.vmem %s1165_s3, %s777_s15 }
  0x2b   : > { %v355_v0 = vld [vmem:[%s330_s24] sm:$0x3f]  ;;  %s337_s8 = scalar_lea.vmem %s1164_s2, %s777_s15  ;;  %s351_s12 = scalar_lea.vmem %s1166_s4, %s777_s15  ;;  %v599_v21 = vstv %s353_s13 }
  0x2c   : > { %357 = vxpose.xlu0.b32.start.end [1/1] (short) (narrow) %v355_v0, 16  ;;  %v356_v1 = vld [vmem:[%s337_s8] sm:$0x3f]  ;;  %s321_s15 = sand.u32 1, %s966_s19   ;;  %s985_s8 = smov [#allocation5]  }
  0x2d   : > { %800 = vmatprep.subr.msk.mxu0 %vm396_vm0, %v356_v1  ;;  %v475_v2 = vld [vmem:[%s344_s29] sm:$0x3f]  ;;  %s776_s16 = sshll.u32 %s321_s15, 4  ;;  %s1117_s21 = scalar_lea.sflag [#allocation3], %s321_s15 }
  0x2e   : > { %801 = vmatpush3.msk.msra.mxu0 %vm396_vm0, %v356_v1  ;;  %v476_v3 = vld [vmem:[%s351_s12] sm:$0x3f]  ;;  %s323_s24 = scalar_lea.vmem [#allocation5], %s776_s16  ;;  %s906_s10 = sshll.u32 %s985_s8, 4  ;;  %s907_s10 = int_to_ptr.vmem [resolvable:$false] %s906_s10 }
  0x2f   : > { %805 = vmatprep.subr.msk.mxu1 %vm396_vm0, %v476_v3  ;;  %v608_v22 = vstv %s781_s14  ;;  %s632_s25 = sshll.u32 %s323_s24, 4  ;;  %s908_s11 = scalar_lea.vmem %s907_s10, 512  ;;  %s1115_s25 = int_to_ptr.vmem [resolvable:$true] %s632_s25 }
  0x30   : > { %806 = vmatpush3.msk.msra.mxu1 %vm396_vm0, %v476_v3  ;;  %s902_s9 = scalar_lea.vmem %s1115_s25, 256  ;;  %p909_p0 = scmp.lt.s32.totalorder %s1115_s25, %s907_s10 }
  0x31   : > { %477 = vxpose.xlu0.b32.start.end [1/1] (short) (narrow) %v475_v2, 16  ;;  %p903_p10 = scmp.ne.s32.totalorder %s1115_s25, %s902_s9  ;;  %p910_p1 = scmp.lt.s32.totalorder %s908_s11, %s902_s9 }
  0x33   : > { %p904_p11 = pnand %p903_p10, %p1058_p4  ;;  %p911_p2 = por %p910_p1, %p909_p0 }
  0x35   : > { %p905_p13 = pneg %p904_p11 }
  0x37   : > { %p912_p3 = pnand %p911_p2, %p905_p13 }
  0xa8   : > { %v373_v4 = vpop.trf.xlu0 }
  0xa9   : > { %802 = vmatprep.mubr.msk.f32.mxu0 %vm389_vm1, %v373_v4 }
  0xac   : > { %v374_v5 = vpop.trf.xlu0 }
  0xad   : > { %803 = vmatmul.mubr.msk.f32.vlgmr.msra.gmra.mxu0 %vm389_vm1, %v374_v5 }
  0xb0   : > { %v493_v6 = vpop.trf.xlu0 }
  0xb1   : > { %807 = vmatprep.mubr.msk.f32.mxu1 %vm389_vm1, %v493_v6 }
  0xb4   : > { %v494_v7 = vpop.trf.xlu0 }
  0xb5   : > { %808 = vmatmul.mubr.msk.f32.vlgmr.msra.gmra.mxu1 %vm389_vm1, %v494_v7 }
 0x16d   : > { %v804_v8 = vpop.f32.mrf.mxu0 }
 0x16e   : > { %v594_v10 = vmin.f32 %v804_v8, 0.0 }
 0x16f   : > { %v466_v9 = vpop.f32.mrf.mxu0 }
 0x170   : > { %v593_v11 = vmin.f32 %v466_v9, 0.0  ;;  %v597_v12 = vmul.f32 1.442695, %v594_v10 }
 0x172   : > { %v595_v13 = vmul.f32 1.442695, %v593_v11  ;;  %879 = vpow2.f32 %v597_v12 }
 0x174   : > { %881 = vpow2.f32 %v595_v13 }
 0x175   : > { %v809_v14 = vpop.f32.mrf.mxu1 }
 0x176   : > { %v603_v15 = vmin.f32 %v809_v14, 0.0 }
 0x177   : > { %v584_v16 = vpop.f32.mrf.mxu1 }
 0x178   : > { %v606_v17 = vmul.f32 1.442695, %v603_v15  ;;  %v602_v18 = vmin.f32 %v584_v16, 0.0 }
 0x17a   : > { %883 = vpow2.f32 %v606_v17  ;;  %v604_v19 = vmul.f32 1.442695, %v602_v18 }
 0x17c   : > { %885 = vpow2.f32 %v604_v19 }
 0x17f   : > { %v880_v20 = vpop.eup %879 }
 0x180   : > { %v601_v25 = vmul.f32 %v880_v20, %v599_v21 }
 0x181   : > { %v882_v23 = vpop.eup %881 }
 0x182   : > { %v600_v28 = vmul.f32 %v882_v23, %v599_v21 }
 0x187   : > { %v884_v24 = vpop.eup %883 }
 0x188   : > { %v610_v26 = vmul.f32 %v884_v24, %v608_v22 }
 0x189   : > { %v886_v27 = vpop.eup %885 }
 0x18a   : > { %v609_v29 = vmul.f32 %v886_v27, %v608_v22  ;;  %v612_v30 = vadd.f32 %v610_v26, %v601_v25 }
 0x18c   : > { %v611_v31 = vadd.f32 %v609_v29, %v600_v28  ;;  %614 = vst [vmem:[%s323_s24 + $0x8] sm:$0xff] %v612_v30 }
 0x18e   : > { %613 = vst [vmem:[%s323_s24] sm:$0xff] %v611_v31 }
 0x18f   : > { %915 = shalt.err (!%p912_p3)
}
 0x190   : > { %s916_s12 = scalar_lea.hbm %s1113_s7, 256  ;;  %s920_s15 = scalar_lea.hbm %s1167_s5, 512 }
 0x191   : > { %p917_p5 = scmp.ne.s32.totalorder %s1113_s7, %s916_s12  ;;  %p921_p9 = scmp.lt.s32.totalorder %s1113_s7, %s1167_s5 }
 0x192   : > { %p922_p12 = scmp.lt.s32.totalorder %s920_s15, %s916_s12 }
 0x193   : > { %p918_p6 = pnand %p917_p5, %p1058_p4 }
 0x194   : > { %p923_p10 = por %p922_p12, %p921_p9 }
 0x195   : > { %p919_p7 = pneg %p918_p6 }
 0x197   : > { %p924_p11 = pnand %p923_p10, %p919_p7 }
 0x199   : > { %927 = shalt.err (!%p924_p11)
}
 0x19a   : > { %s986_s24 = smov 128   ;;  %s987_s27 = smov 8  }
 0x19b   : > { %814 = dma.vmem_to_hbm [thread:$0]  (%p1058_p4), %s1115_s25, 256, %s1113_s7, %s1117_s21, %s986_s24, %s986_s24, %s987_s27  }
 0x19c PF: > { %p826_p13 = scmp.ge.s32.totalorder %s982_s23, 2  ;;  %s647_s29 = sand.u32 1, %s962_s18  }
 0x19d   : > { %s648_s9 = scalar_lea.sflag [#allocation3], %s647_s29 }
 0x19e   : > { %p821_p0 = pnand %p826_p13, %p1065_p8 }
 0x1a0   : > { %p822_p1 = pneg %p821_p0 }
 0x1a2   : > { %957 = dma.done.wait (%p822_p1), %s648_s9, 256  }
 0x1a3   : > { %959 = vsyncadd (%p822_p1), %s648_s9, 4294967040  ;;  %s19_s23 = sadd.s32 1, %s982_s23   ;;  %s1172_s18 = smov %s966_s19 }
 0x1a4   : > { %p16_p2 = scmp.ge.s32.totalorder %s19_s23, 4   ;;  %s1173_s19 = smov %s970_s20 }
 0x1a5   : > { %s1174_s20 = smov %s1071_s6  ;;  %s1175_s21 = smov %s978_s22 }
 0x1a6   : > { %s1176_s22 = smov %s1178_s26  ;;  %18 = sbr.rel (!%p16_p2) target bundleno = 5 (0x5), region = 89 }
 0x1ab   :  { %653 = vsyncpa [#allocation3], 1 }
 0x1ac   :  { %655 = vsyncpa [#allocation3 + $0x1], 1 }
 0x1ad   :  { %656 = vsyncpa [#allocation4], 1 }
 0x1ae   :  { %658 = vsyncpa [#allocation4 + $0x1], 1 }

</bundles_post_ra>
